<compile_context>
chip_gen: v7x
topology: tpu7x:2x2x1
jax: 0.10.0
libtpu: 0.0.40
codegen_flags: <defaults>
</compile_context>

<pallas_src>
import functools

import jax
import jax.numpy as jnp
from jax.experimental import pallas as pl
from jax.experimental.pallas import tpu as pltpu


def _round_up(x, m):
    return -(-x // m) * m


def _tpu_vmem_capacity_bytes():
    """Physical VMEM per TensorCore; used to pick per-generation budgets."""
    try:
        cap = int(pltpu.get_tpu_info().vmem_capacity_bytes)
        if cap > 0:
            return cap
    except Exception:
        pass
    return 64 * 2 ** 20  # conservative fallback: treat as v7x-class (64 MiB / TC)


def _pick_tile_and_vmem(n, c, itemsize, reduction, requested=None):
    """Footprint-aware batch-tile size and matching vmem_limit_bytes."""
    cap = _tpu_vmem_capacity_bytes()
    small_vmem = cap < 96 * 2 ** 20          # v7x-class: 64 MiB per TensorCore

    usable = (36 if small_vmem else 56) * 2 ** 20    # VMEM budget for tiling
    max_block = (6 if small_vmem else 12) * 2 ** 20  # cap on the logits block bytes

    # Real per-row VMEM bytes:
    #   2*C*isz   : double-buffered (tile, C) logits block
    #   4*C*4     : live f32 (tile, C) temps (cast, x-m, exp, masked select)
    #   4*512     : (tile,1) target + hoisted-weight blocks, 128-lane padded, x2 buffers
    #   6*512     : (tile,1) f32 column temps (m, s, x_t, log_p, p, loss)
    #   2*512     : 'none' (tile,1) output block, x2 buffers
    per_row = (2 * c * itemsize
               + 4 * c * 4
               + 4 * 512
               + 6 * 512
               + (2 * 512 if reduction == "none" else 0))
    fixed = 256 << 10                          # misc slack

    if requested is None:
        tile = (usable - fixed) // per_row
        tile = min(tile, max(1, max_block // max(1, c * itemsize)))
    else:
        tile = int(requested)

    tile = max(1, min(tile, n))
    if small_vmem and n > 8:
        # Keep >= 2 grid steps so the "parallel" axis can shard across v7x's 2 TCs.
        half8 = min(n, _round_up(_round_up(n, 2) // 2, 8))
        tile = min(tile, half8)
    if tile < n:
        tile = max(8, (tile // 8) * 8)         # partial tiles must be sublane aligned
        tile = min(tile, n)

    footprint = fixed + per_row * tile
    vmem_limit = footprint + (8 << 20)         # headroom for Mosaic internal scratch
    vmem_limit = max(vmem_limit, 32 * 2 ** 20)
    vmem_limit = min(vmem_limit, cap - (8 << 20))
    return tile, int(vmem_limit)


def _focal_loss_kernel(x_ref, t_ref, wt_ref, out_ref, *, gamma, rem, reduction):
    x = x_ref[...].astype(jnp.float32)          # (T, C) logits (cast in-kernel)
    t = t_ref[...]                              # (T, 1) int32 labels
    w_t = wt_ref[...]                           # (T, 1) f32 class weight at target

    tile, c = x.shape

    # Full-width work: softmax statistics + target-logit gather (3 reductions,
    # one select, no full-width multiplies).
    m = jnp.max(x, axis=1, keepdims=True)                       # (T, 1)
    s = jnp.sum(jnp.exp(x - m), axis=1, keepdims=True)          # (T, 1)

    col = jax.lax.broadcasted_iota(jnp.int32, (tile, c), 1)
    x_t = jnp.sum(jnp.where(col == t, x, 0.0), axis=1, keepdims=True)  # logit@target

    # Per-row epilogue on T elements (no e_t / reciprocal: log-softmax first,
    # then one EUP exp).
    log_p_t = (x_t - m) - jnp.log(s)            # log-softmax at the target class
    p_t = jnp.exp(log_p_t)                      # softmax at the target class

    one_minus_p = 1.0 - p_t
    g = float(gamma)
    if g.is_integer() and 0 <= g <= 16:
        gi = int(g)
        focal = jnp.ones_like(one_minus_p) if gi == 0 else one_minus_p
        for _ in range(max(0, gi - 1)):         # gamma=2 -> a single extra VPU mul
            focal = focal * one_minus_p
    else:
        focal = jnp.power(one_minus_p, jnp.float32(g))

    loss_t = -w_t * focal * log_p_t             # (T, 1)

    if reduction == "none":
        # Rows past the batch end fall outside the (N,1) output array; Pallas only
        # writes the in-bounds part of the last block, so no masking is needed.
        out_ref[...] = loss_t
        return

    if rem == 0:
        # Batch divides the tile exactly: no padded-row masking anywhere.
        out_ref[...] = jnp.sum(loss_t, keepdims=True).reshape(1, 1, 1)
        return

    is_last = pl.program_id(0) == pl.num_programs(0) - 1

    @pl.when(is_last)
    def _():
        row = jax.lax.broadcasted_iota(jnp.int32, (tile, 1), 0)
        masked = jnp.where(row < rem, loss_t, 0.0)
        out_ref[...] = jnp.sum(masked, keepdims=True).reshape(1, 1, 1)

    @pl.when(jnp.logical_not(is_last))
    def _():
        out_ref[...] = jnp.sum(loss_t, keepdims=True).reshape(1, 1, 1)


def focal_loss(logits, target, weight, gamma=2.0, reduction="mean", tile_n=None):
    """Pallas TPU implementation of FocalLoss.forward.

    Args:
      logits: (N, C) float array (any float dtype; cast in-kernel).
      target: (N,) integer labels in [0, C).
      weight: (C,) per-class weights.
    Returns:
      scalar for 'mean'/'sum', or (N,) float32 per-sample loss for 'none'.
    """
    assert reduction in ("none", "mean", "sum")
    n, c = logits.shape

    t_col = target.reshape(n, 1).astype(jnp.int32)
    # Hoisted class-weight gather (review): a tiny XLA gather (4N bytes) replaces
    # an in-kernel (tile, C) multiply + cross-lane reduction.
    w_t_col = jnp.take(weight.astype(jnp.float32), target.reshape(n)).reshape(n, 1)

    itemsize = jnp.dtype(logits.dtype).itemsize
    tile, vmem_limit = _pick_tile_and_vmem(n, c, itemsize, reduction, tile_n)
    num_tiles = pl.cdiv(n, tile)
    rem = n % tile

    kernel = functools.partial(_focal_loss_kernel, gamma=float(gamma), rem=rem,
                               reduction=reduction)

    in_specs = [
        pl.BlockSpec((tile, c), lambda i: (i, 0)),   # logits: pipelined over batch
        pl.BlockSpec((tile, 1), lambda i: (i, 0)),   # targets
        pl.BlockSpec((tile, 1), lambda i: (i, 0)),   # hoisted per-row class weights
    ]

    if reduction == "none":
        out_shape = jax.ShapeDtypeStruct((n, 1), jnp.float32)
        out_specs = pl.BlockSpec((tile, 1), lambda i: (i, 0))
    else:
        # One partial sum per tile; final sum (and /N) in the wrapper so the grid
        # axis stays "parallel" (v7x megacore friendly).
        out_shape = jax.ShapeDtypeStruct((num_tiles, 1, 1), jnp.float32)
        out_specs = pl.BlockSpec((1, 1, 1), lambda i: (i, 0, 0))

    out = pl.pallas_call(
        kernel,
        out_shape=out_shape,
        grid=(num_tiles,),
        in_specs=in_specs,
        out_specs=out_specs,
        compiler_params=pltpu.CompilerParams(
            dimension_semantics=("parallel",),
            vmem_limit_bytes=vmem_limit,
        ),
    )(logits, t_col, w_t_col)

    if reduction == "none":
        return out.reshape(n)      # float32 even for bf16 inputs (documented deviation)
    total = jnp.sum(out)
    if reduction == "sum":
        return total
    return total / n               # 'mean': single divide, once


def _focal_loss_ref(logits, target, weight, gamma=2.0, reduction="mean"):
    """Pure-JAX reference matching the PyTorch module (for verification)."""
    p = jax.nn.softmax(logits.astype(jnp.float32), axis=1)
    loss = -weight.astype(jnp.float32)[None, :] * jnp.power(1.0 - p, gamma) * jnp.log(p)
    mask = jax.nn.one_hot(target, logits.shape[1], dtype=jnp.float32)
    loss = jnp.sum(loss * mask, axis=1)
    if reduction == "mean":
        return jnp.mean(loss)
    if reduction == "sum":
        return jnp.sum(loss)
    return loss


if __name__ == "__main__":
    # Small shape consistent with the module: (N=batch, C=class_num).
    N, C = 8, 32
    key = jax.random.PRNGKey(0)
    k1, k2, k3 = jax.random.split(key, 3)

    logits = jax.random.normal(k1, (N, C), dtype=jnp.float32)
    target = jax.random.randint(k2, (N,), 0, C, dtype=jnp.int32)
    weight = jnp.ones((C,), dtype=jnp.float32)   # FocalLoss(weight=C) -> torch.ones(C)

    out = jax.block_until_ready(focal_loss(logits, target, weight, 2.0, "mean"))
    ref = _focal_loss_ref(logits, target, weight, 2.0, "mean")
    assert jnp.allclose(out, ref, rtol=1e-5, atol=1e-6), (out, ref)

    # Non-integer gamma exercises the jnp.power fallback.
    out_g = jax.block_until_ready(focal_loss(logits, target, weight, 1.5, "mean"))
    ref_g = _focal_loss_ref(logits, target, weight, 1.5, "mean")
    assert jnp.allclose(out_g, ref_g, rtol=1e-4, atol=1e-5), (out_g, ref_g)

    # Forced multi-tile + padded final tile + all reductions.
    N2, C2 = 300, 96
    logits2 = jax.random.normal(k3, (N2, C2), dtype=jnp.float32)
    target2 = jax.random.randint(k2, (N2,), 0, C2, dtype=jnp.int32)
    weight2 = (jnp.arange(C2, dtype=jnp.float32) % 5.0) * 0.25 + 0.5
    for rd in ("mean", "sum", "none"):
        got = jax.block_until_ready(
            focal_loss(logits2, target2, weight2, 2.0, rd, tile_n=128))
        want = _focal_loss_ref(logits2, target2, weight2, 2.0, rd)
        assert jnp.allclose(got, want, rtol=1e-4, atol=1e-5), (rd, got, want)

    # Auto-tiled path (footprint-sized tile; >=2 tiles on small-VMEM chips).
    got = jax.block_until_ready(focal_loss(logits2, target2, weight2, 2.0, "mean"))
    want = _focal_loss_ref(logits2, target2, weight2, 2.0, "mean")
    assert jnp.allclose(got, want, rtol=1e-4, atol=1e-5), (got, want)

    print("KERNEL_OK")
</pallas_src>

<mosaic_0001>
module attributes {stable_mosaic.version = 11 : i64} {
  func.func @_focal_loss_kernel(%arg0: i32, %arg1: memref<8x32xf32, #tpu.memory_space<vmem>>, %arg2: memref<8x1xi32, #tpu.memory_space<vmem>>, %arg3: memref<8x1xf32, #tpu.memory_space<vmem>>, %arg4: memref<1x1x1xf32, #tpu.memory_space<vmem>>) attributes {dimension_semantics = [#tpu.dimension_semantics<parallel>], iteration_bounds = array<i64: 1>, scalar_prefetch = 0 : i64, scratch_operands = 0 : i64, tpu.core_type = #tpu.core_type<tc>, window_params = [{transform_indices = @transform_0, window_bounds = array<i64: 8, 32>}, {transform_indices = @transform_1, window_bounds = array<i64: 8, 1>}, {transform_indices = @transform_2, window_bounds = array<i64: 8, 1>}, {transform_indices = @transform_3, window_bounds = array<i64: 1, 1, 1>}]} {
    %c0 = arith.constant 0 : index
    %c0_0 = arith.constant 0 : index
    %0 = vector.load %arg1[%c0, %c0_0] : memref<8x32xf32, #tpu.memory_space<vmem>>, vector<8x32xf32>
    %c0_1 = arith.constant 0 : index
    %c0_2 = arith.constant 0 : index
    %1 = vector.load %arg2[%c0_1, %c0_2] : memref<8x1xi32, #tpu.memory_space<vmem>>, vector<8x1xi32>
    %c0_3 = arith.constant 0 : index
    %c0_4 = arith.constant 0 : index
    %2 = vector.load %arg3[%c0_3, %c0_4] : memref<8x1xf32, #tpu.memory_space<vmem>>, vector<8x1xf32>
    %cst = arith.constant dense<0xFF800000> : vector<8xf32>
    %3 = vector.multi_reduction <maximumf>, %0, %cst [1] : vector<8x32xf32> to vector<8xf32>
    %4 = vector.shape_cast %3 : vector<8xf32> to vector<8x1xf32>
    %5 = vector.broadcast %4 : vector<8x1xf32> to vector<8x32xf32>
    %6 = arith.subf %0, %5 : vector<8x32xf32>
    %7 = math.exp %6 : vector<8x32xf32>
    %cst_5 = arith.constant dense<0.000000e+00> : vector<8xf32>
    %8 = vector.multi_reduction <add>, %7, %cst_5 [1] : vector<8x32xf32> to vector<8xf32>
    %9 = vector.shape_cast %8 : vector<8xf32> to vector<8x1xf32>
    %10 = tpu.iota {dimensions = array<i32: 1>} : vector<8x32xi32>
    %11 = vector.broadcast %1 : vector<8x1xi32> to vector<8x32xi32>
    %12 = arith.cmpi eq, %10, %11 : vector<8x32xi32>
    %cst_6 = arith.constant 0.000000e+00 : f32
    %13 = vector.broadcast %cst_6 : f32 to vector<8x32xf32>
    %14 = arith.select %12, %0, %13 : vector<8x32xi1>, vector<8x32xf32>
    %cst_7 = arith.constant dense<0.000000e+00> : vector<8xf32>
    %15 = vector.multi_reduction <add>, %14, %cst_7 [1] : vector<8x32xf32> to vector<8xf32>
    %16 = vector.shape_cast %15 : vector<8xf32> to vector<8x1xf32>
    %17 = arith.subf %16, %4 : vector<8x1xf32>
    %18 = math.log %9 : vector<8x1xf32>
    %19 = arith.subf %17, %18 : vector<8x1xf32>
    %20 = math.exp %19 : vector<8x1xf32>
    %cst_8 = arith.constant 1.000000e+00 : f32
    %21 = vector.broadcast %cst_8 : f32 to vector<8x1xf32>
    %22 = arith.subf %21, %20 : vector<8x1xf32>
    %23 = arith.mulf %22, %22 : vector<8x1xf32>
    %cst_9 = arith.constant 0.000000e+00 : f32
    %24 = vector.broadcast %cst_9 : f32 to vector<8x1xf32>
    %25 = arith.subf %24, %2 : vector<8x1xf32>
    %26 = arith.mulf %25, %23 : vector<8x1xf32>
    %27 = arith.mulf %26, %19 : vector<8x1xf32>
    %28 = vector.shape_cast %27 : vector<8x1xf32> to vector<1x8x1xf32>
    %cst_10 = arith.constant dense<0.000000e+00> : vector<1xf32>
    %29 = vector.multi_reduction <add>, %28, %cst_10 [1, 2] : vector<1x8x1xf32> to vector<1xf32>
    %30 = vector.shape_cast %29 : vector<1xf32> to vector<1x1x1xf32>
    %31 = vector.extract %30[0, 0, 0] : f32 from vector<1x1x1xf32>
    %32 = vector.broadcast %31 : f32 to vector<1x1xf32>
    %33 = vector.shape_cast %32 : vector<1x1xf32> to vector<1x1x1xf32>
    %c0_11 = arith.constant 0 : index
    %c0_12 = arith.constant 0 : index
    %c0_13 = arith.constant 0 : index
    %34 = vector.load %arg4[%c0_11, %c0_12, %c0_13] : memref<1x1x1xf32, #tpu.memory_space<vmem>>, vector<1x1x1xf32>
    tpu.vector_store %arg4[%c0_11, %c0_12, %c0_13], %33 {strides = array<i32>} : memref<1x1x1xf32, #tpu.memory_space<vmem>>, vector<1x1x1xf32>,
    return
  }
  func.func @transform_0(%arg0: i32) -> (i32, i32) {
    %c0_i32 = arith.constant 0 : i32
    %c0_i32_0 = arith.constant 0 : i32
    return %arg0, %c0_i32 : i32, i32
  }
  func.func @transform_1(%arg0: i32) -> (i32, i32) {
    %c0_i32 = arith.constant 0 : i32
    %c0_i32_0 = arith.constant 0 : i32
    return %arg0, %c0_i32 : i32, i32
  }
  func.func @transform_2(%arg0: i32) -> (i32, i32) {
    %c0_i32 = arith.constant 0 : i32
    %c0_i32_0 = arith.constant 0 : i32
    return %arg0, %c0_i32 : i32, i32
  }
  func.func @transform_3(%arg0: i32) -> (i32, i32, i32) {
    %c0_i32 = arith.constant 0 : i32
    %c0_i32_0 = arith.constant 0 : i32
    %c0_i32_1 = arith.constant 0 : i32
    return %arg0, %c0_i32, %c0_i32_0 : i32, i32, i32
  }
}

</mosaic_0001>

<bundles_post_ra>
// kernel: tpu_custom_call.1
= control target key start
LH: loop header
LB: loop body
LE: loop exit
PB: predicated region body
PF: predicated region fallthrough
CT: control target
= control target key end

     0   :  { %vm18_vm0 = vcmask 261120   ;;  %s158_s0 = inlined_call_operand.vmem [shape: f32[8,32], index: 0, kind: input, shape index: {}]   ;;  %s159_s1 = inlined_call_operand.vmem [shape: s32[8,1], index: 1, kind: input, shape index: {}]   ;;  %s160_s2 = inlined_call_operand.vmem [shape: f32[8,1], index: 2, kind: input, shape index: {}]   ;;  %s161_s3 = inlined_call_operand.hbm [shape: f32[1,1,1], index: 3, kind: output, shape index: {}]  }
   0x1   :  { %v15_v0 = vld [vmem:[%s158_s0] sm:$0xff] }
   0x2   :  { %8 = vsyncpa [#allocation3], 0  ;;  %v19_v1 = vsel %vm18_vm0, %v15_v0, -inf  ;;  %v112_v2 = vmov 0   ;;  %v16_v3 = vld [vmem:[%s159_s1] sm:$0xff]  ;;  %v28_v7 = vlaneseq  ;;  %vm49_vm2 = vcmask 7168  }
   0x3   :  { %81 = vset.pattern.permute.xlu0 %v112_v2  ;;  %v17_v21 = vld [vmem:[%s160_s2] sm:$0xff]  ;;  %s113_s16 = smov [#allocation2]   ;;  %vm61_vm3 = vcmask 0  }
   0x4   :  { %20 = vmax.xlane.f32.xlu0 %v19_v1  ;;  %v29_v8 = vand.u32 127, %v28_v7  ;;  %v46_v24 = vsub.f32 0.0, %v17_v21  ;;  %s69_s17 = sshll.u32 %s113_s16, 4  ;;  %s70_s17 = int_to_ptr.vmem [resolvable:$true] %s69_s17 }
   0x5   :  { %s88_s18 = scalar_lea.vmem %s70_s17, 16  ;;  %s92_s19 = scalar_lea.vmem %s70_s17, 32 }
   0x6   :  { %p89_p0 = scmp.ne.s32.totalorder %s70_s17, %s88_s18  ;;  %p93_p1 = scmp.lt.s32.totalorder %s70_s17, %s70_s17 }
   0x7   :  { %p94_p2 = scmp.lt.s32.totalorder %s92_s19, %s88_s18 }
   0x9   :  { %p95_p3 = por %p94_p2, %p93_p1 }
   0xb   :  { %p96_p4 = pnand %p95_p3, %p89_p0 }
  0x1a   :  { %31 = vperm.xlu0 %81, %v16_v3  }
  0x91   :  { %v21_v4 = vpop.xlane.xlu0 %20 }
  0x92   :  { %v22_v5 = vsub.f32 %v15_v0, %v21_v4 }
  0x94   :  { %v23_v6 = vmul.f32 1.442695, %v22_v5 }
  0x96   :  { %82 = vpow2.f32 %v23_v6 }
  0x99   :  { %v32_v9 = vpop.permute.xlu0 %31 }
  0x9a   :  { %vm33_vm1 = vcmp.eq.s32.totalorder %v29_v8, %v32_v9 }
  0x9b   :  { %v34_v11 = vsel %vm33_vm1, %v15_v0, 0.0 }
  0x9c   :  { %v35_v13 = vsel %vm18_vm0, %v34_v11, 0.0 }
  0xa0   :  { %v83_v10 = vpop.eup %82 }
  0xa1   :  { %v25_v12 = vsel %vm18_vm0, %v83_v10, 0.0 }
  0xa2   :  { %26 = vadd.xlane.f32.xlu1 %v25_v12 }
  0xa6   :  { %36 = vadd.xlane.f32.xlu1 %v35_v13 }
 0x12f   :  { %v27_v14 = vpop.xlane.xlu1 %26 }
 0x130   :  { %84 = vlog2.f32 %v27_v14 }
 0x133   :  { %v37_v15 = vpop.xlane.xlu1 %36 }
 0x134   :  { %v38_v18 = vsub.f32 %v37_v15, %v21_v4 }
 0x13a   :  { %v85_v16 = vpop.eup %84 }
 0x13b   :  { %v40_v17 = vmul.f32 0.6931472, %v85_v16 }
 0x13d   :  { %v41_v19 = vsub.f32 %v38_v18, %v40_v17 }
 0x13f   :  { %v42_v20 = vmul.f32 1.442695, %v41_v19 }
 0x141   :  { %86 = vpow2.f32 %v42_v20 }
 0x14b   :  { %v87_v22 = vpop.eup %86 }
 0x14c   :  { %v44_v23 = vsub.f32 1.0, %v87_v22 }
 0x14e   :  { %v45_v25 = vmul.f32 %v44_v23, %v44_v23 }
 0x150   :  { %v47_v26 = vmul.f32 %v46_v24, %v45_v25 }
 0x152   :  { %v48_v27 = vmul.f32 %v47_v26, %v41_v19 }
 0x154   :  { %v50_v28 = vsel %vm49_vm2, %v48_v27, 0.0 }
 0x155   :  { %51 = vadd.xlane.f32.xlu1 %v50_v28 }
 0x1e2   :  { %v52_v29 = vpop.xlane.xlu1 %51 }
 0x1e3   :  { %v53_v30 = vrot.slane %v52_v29, 4 }
 0x1e5   :  { %v54_v31 = vadd.f32 %v53_v30, %v52_v29 }
 0x1e7   :  { %v55_v32 = vrot.slane %v54_v31, 2 }
 0x1e9   :  { %v56_v33 = vadd.f32 %v55_v32, %v54_v31 }
 0x1eb   :  { %v57_v34 = vrot.slane %v56_v33, 1 }
 0x1ed   :  { %v58_v35 = vadd.f32 %v57_v34, %v56_v33 }
 0x1ef   :  { %77 = vpush %v58_v35 }
 0x220   :  { %s78_s2 = spop %77 }
 0x221   :  { %v60_v36 = vstv %s78_s2 }
 0x222   :  { %62 = vst.msk [vmem:[#allocation2] sm:$0x1] %vm61_vm3, %v60_v36 }
 0x223   :  { %99 = shalt.err (!%p96_p4)
}
 0x224   :  { %s100_s22 = scalar_lea.hbm %s161_s3, 16 }
 0x225   :  { %p101_p5 = scmp.ne.s32.totalorder %s161_s3, %s100_s22  ;;  %p104_p6 = scmp.lt.u32.totalorder %s100_s22, %s161_s3 }
 0x227   :  { %p106_p7 = pnand %p104_p6, %p101_p5 }
 0x229   :  { %109 = shalt.err (!%p106_p7)
}
 0x22a   :  { %72 = dma.vmem_to_hbm [thread:$0]  %s70_s17, 16, %s161_s3, [#allocation3]  }
 0x22b   :  { %110 = dma.done.wait [#allocation3], 16  }
 0x22c   :  { %111 = vsyncadd [#allocation3], 4294967280 }
 0x22d   :  { %76 = vsyncpa [#allocation3], 1 }

</bundles_post_ra>
